<compile_context>
chip_gen: v6e
topology: v6e:2x2x1
jax: 0.10.0
libtpu: 0.0.40
codegen_flags: <defaults>
</compile_context>

<pallas_src>
import functools
import math

import numpy as np
import jax
import jax.numpy as jnp
from jax import lax
from jax.experimental import pallas as pl
from jax.experimental.pallas import tpu as pltpu


# --------------------------------------------------------------------------- fused kernel

def _make_fused_kernel(K, Nb, H, W, Ho, Cin, C1, has_up):
    p = K // 2

    def stage_lhs(lhs_ref, v_bf, row0, Hv, Wc):
        """Write K row-shifted, H-replicate-padded copies of v_bf (Hv, Wc) bf16 into the
        K lane-column blocks of lhs_ref rows [row0, row0+Hv)."""
        for kh in range(K):
            off = kh - p
            c0, c1 = kh * Wc, (kh + 1) * Wc
            if off < 0:
                a = -off
                lhs_ref[row0 + a:row0 + Hv, c0:c1] = v_bf[0:Hv - a, :]
                for i in range(a):                           # top replicate rows
                    lhs_ref[row0 + i:row0 + i + 1, c0:c1] = v_bf[0:1, :]
            elif off == 0:
                lhs_ref[row0:row0 + Hv, c0:c1] = v_bf
            else:
                lhs_ref[row0:row0 + Hv - off, c0:c1] = v_bf[off:Hv, :]
                for i in range(off):                         # bottom replicate rows
                    lhs_ref[row0 + Hv - 1 - i:row0 + Hv - i, c0:c1] = v_bf[Hv - 1:Hv, :]

    def kernel(*refs):
        if has_up:
            (x_ref, wb1_ref, b1_ref, uh_ref, wb2_ref, b2_ref,
             o_ref, lhs1_ref, lhs2_ref) = refs
        else:
            (x_ref, wb1_ref, b1_ref, wb2_ref, b2_ref,
             o_ref, lhs1_ref, lhs2_ref) = refs

        # ---- conv1: stage bf16 banded-GEMM LHS, one GEMM for all Nb images -------------
        for b in range(Nb):
            stage_lhs(lhs1_ref, x_ref[b].astype(jnp.bfloat16), b * H, H, W * Cin)
        y1 = jnp.dot(lhs1_ref[...], wb1_ref[...],
                     preferred_element_type=jnp.float32) + b1_ref[...]     # (Nb*H, W*C1)

        # ---- bilinear row-upsample (align_corners=False) + conv2 LHS staging -----------
        for b in range(Nb):
            yb = y1[b * H:(b + 1) * H]
            if has_up:
                yb = jnp.dot(uh_ref[...], yb.astype(jnp.bfloat16),
                             preferred_element_type=jnp.float32)           # (Ho, W*C1)
            stage_lhs(lhs2_ref, yb.astype(jnp.bfloat16), b * Ho, Ho, W * C1)

        # ---- conv2 (column upsample folded into wb2): one GEMM, lane-dense store -------
        y2 = jnp.dot(lhs2_ref[...], wb2_ref[...],
                     preferred_element_type=jnp.float32) + b2_ref[...]     # (Nb*Ho, Wo*C2)
        for b in range(Nb):
            o_ref[b] = y2[b * Ho:(b + 1) * Ho].astype(o_ref.dtype)

    return kernel


# --------------------------------------------------------------------------- wrapper-side prep

def _banded_conv_weight(w, W):
    """(K, K, Cin, Cout) conv weight -> (K*W*Cin, W*Cout) banded GEMM matrix.

    Folds the W-direction taps and the replicate ('edge') W-padding into the GEMM so that
    in the (rows=H, lanes=W*C) layout:  conv(x) == concat_kh(x_hpad[kh:kh+H, :]) @ banded.
    """
    K, _, Cin, Cout = w.shape
    p = K // 2
    wo = np.arange(W)[None, :, None]
    kw = np.arange(K)[:, None, None]
    win = np.arange(W)[None, None, :]
    sel = (win == np.clip(wo + kw - p, 0, W - 1)).astype(np.float32)   # (K, W_out, W_in)
    band = jnp.einsum('xwv,kxco->kvcwo', jnp.asarray(sel), w)          # (K, W_in, Cin, W_out, Cout)
    return band.reshape(K * W * Cin, W * Cout)


def _interp_matrix(L, scale):
    """PyTorch bilinear (align_corners=False) 1-D interpolation matrix, shape (floor(L*scale), L)."""
    Lo = int(math.floor(L * scale))
    o = np.arange(Lo, dtype=np.float64)
    src = np.maximum((o + 0.5) / scale - 0.5, 0.0)   # PyTorch clamps negatives to 0
    i0 = np.minimum(np.floor(src).astype(np.int64), L - 1)
    i1 = np.minimum(i0 + 1, L - 1)
    w1 = (src - i0).astype(np.float32)
    A = np.zeros((Lo, L), np.float32)
    A[np.arange(Lo), i0] += 1.0 - w1
    A[np.arange(Lo), i1] += w1
    return A


def prepare_conv2d_upsample(params, *, height, width, kernel_size, strides):
    """One-time weight prep (run OUTSIDE the jitted forward / training step)."""
    H, W, K = height, width, kernel_size
    w1, b1 = params["w1"], params["b1"]            # (K,K,Cin,C1), (C1,)
    w2, b2 = params["w2"], params["b2"]            # (K,K,C1,C2), (C2,)
    C1, C2 = w1.shape[-1], w2.shape[-1]
    has_up = strides > 1
    Ho = int(math.floor(H * strides)) if has_up else H
    Wo = int(math.floor(W * strides)) if has_up else W

    wb1 = _banded_conv_weight(w1, W)               # (K*W*Cin,  W*C1) f32
    wb2 = _banded_conv_weight(w2, Wo)              # (K*Wo*C1, Wo*C2) f32
    prepared = {}
    if has_up:
        # Row-upsample matrix (kept as a tiny in-kernel matmul).
        prepared["uh"] = jnp.asarray(_interp_matrix(H, strides), jnp.bfloat16)   # (Ho, H)
        # Column-upsample matrix, folded into conv2's banded weights in f32 (one bf16
        # rounding of weights total, zero extra activation roundings).
        a_w = _interp_matrix(W, strides)                                         # (Wo, W)
        uw = jnp.asarray(np.einsum('vw,cd->wcvd', a_w, np.eye(C1, dtype=np.float32))
                         .reshape(W * C1, Wo * C1))                              # (W*C1, Wo*C1)
        wb2 = jnp.einsum('vu,kuo->kvo', uw,
                         wb2.reshape(K, Wo * C1, Wo * C2)).reshape(K * W * C1, Wo * C2)

    prepared["wb1"] = wb1.astype(jnp.bfloat16)
    prepared["b1r"] = jnp.tile(b1, W).reshape(1, W * C1).astype(jnp.float32)
    prepared["wb2"] = wb2.astype(jnp.bfloat16)          # (K*W*C1, Wo*C2)
    prepared["b2r"] = jnp.tile(b2, Wo).reshape(1, Wo * C2).astype(jnp.float32)
    return prepared


def _pick_batch_tile(N, Ho):
    """Images per grid step: fill the GEMM M dim (~<=256 rows) but keep >=2 grid steps
    when N >= 2 so both v7x TensorCores stay busy."""
    target = max(1, 256 // max(Ho, 1))
    best = 1
    for nb in range(1, N + 1):
        if N % nb != 0:
            continue
        if N >= 2 and (N // nb) < 2:
            continue
        if nb <= target:
            best = nb
    return best


def conv2d_upsample_forward(prepared, x, *, kernel_size, strides):
    """Conv2DUpsampleBlock forward.  x: (N, H, W, Cin) float32, NHWC."""
    N, H, W, Cin = x.shape
    K = kernel_size
    has_up = strides > 1
    Ho = int(math.floor(H * strides)) if has_up else H
    Wo = int(math.floor(W * strides)) if has_up else W
    C1 = prepared["b1r"].shape[1] // W
    C2 = prepared["b2r"].shape[1] // Wo

    Nb = _pick_batch_tile(N, Ho)
    grid = (N // Nb,)

    x3 = x.reshape(N, H, W * Cin)                                       # lane-dense layout

    inputs = [x3, prepared["wb1"], prepared["b1r"]]
    in_specs = [
        pl.BlockSpec((Nb, H, W * Cin), lambda n: (n, 0, 0)),
        pl.BlockSpec((K * W * Cin, W * C1), lambda n: (0, 0)),
        pl.BlockSpec((1, W * C1), lambda n: (0, 0)),
    ]
    if has_up:
        inputs.append(prepared["uh"])
        in_specs.append(pl.BlockSpec((Ho, H), lambda n: (0, 0)))
    inputs += [prepared["wb2"], prepared["b2r"]]
    in_specs += [
        pl.BlockSpec((K * W * C1, Wo * C2), lambda n: (0, 0)),
        pl.BlockSpec((1, Wo * C2), lambda n: (0, 0)),
    ]

    kernel = _make_fused_kernel(K, Nb, H, W, Ho, Cin, C1, has_up)
    out = pl.pallas_call(
        kernel,
        out_shape=jax.ShapeDtypeStruct((N, Ho, Wo * C2), jnp.float32),
        grid=grid,
        in_specs=in_specs,
        out_specs=pl.BlockSpec((Nb, Ho, Wo * C2), lambda n: (n, 0, 0)),
        scratch_shapes=[
            pltpu.VMEM((Nb * H, K * W * Cin), jnp.bfloat16),    # conv1 GEMM LHS (bf16 staged)
            pltpu.VMEM((Nb * Ho, K * W * C1), jnp.bfloat16),    # conv2 GEMM LHS (bf16 staged)
        ],
        compiler_params=pltpu.CompilerParams(
            dimension_semantics=("parallel",),
        ),
    )(*inputs)
    return out.reshape(N, Ho, Wo, C2)


# --------------------------------------------------------------------------- parameters

def _xavier_conv(key, cin, cout, k):
    # Conv2DBlock with activation=None: xavier_uniform (gain=1), zero bias.
    fan_in = cin * k * k
    fan_out = cout * k * k
    bound = math.sqrt(6.0 / (fan_in + fan_out))
    w = jax.random.uniform(key, (k, k, cin, cout), jnp.float32, -bound, bound)
    b = jnp.zeros((cout,), jnp.float32)
    return w, b


def init_params(key, in_channels, out_channels, kernel_size):
    k1, k2 = jax.random.split(key)
    w1, b1 = _xavier_conv(k1, in_channels, out_channels, kernel_size)
    w2, b2 = _xavier_conv(k2, out_channels, out_channels, kernel_size)
    return {"w1": w1, "b1": b1, "w2": w2, "b2": b2}


# --------------------------------------------------------------------------- pure-JAX reference

def _conv2d_block_ref(x, w, b):
    K = w.shape[0]
    p = K // 2
    xp = jnp.pad(x, ((0, 0), (p, p), (p, p), (0, 0)), mode="edge")
    y = lax.conv_general_dilated(xp, w, window_strides=(1, 1), padding="VALID",
                                 dimension_numbers=("NHWC", "HWIO", "NHWC"),
                                 precision=lax.Precision.HIGHEST)
    return y + b.reshape(1, 1, 1, -1)


def _upsample_bilinear_ref(x, scale):
    for axis in (1, 2):
        L = x.shape[axis]
        Lo = int(math.floor(L * scale))
        o = np.arange(Lo, dtype=np.float64)
        src = np.maximum((o + 0.5) / scale - 0.5, 0.0)
        i0 = np.minimum(np.floor(src).astype(np.int32), L - 1)
        i1 = np.minimum(i0 + 1, L - 1)
        w1 = (src - i0).astype(np.float32)
        shp = [1, 1, 1, 1]
        shp[axis] = -1
        x = (jnp.take(x, jnp.asarray(i0), axis=axis) * (1.0 - w1).reshape(shp)
             + jnp.take(x, jnp.asarray(i1), axis=axis) * w1.reshape(shp))
    return x


def _forward_ref(params, x, *, kernel_size, strides):
    y = _conv2d_block_ref(x, params["w1"], params["b1"])
    if strides > 1:
        y = _upsample_bilinear_ref(y, strides)
    return _conv2d_block_ref(y, params["w2"], params["b2"])


# --------------------------------------------------------------------------- main

if __name__ == "__main__":
    key = jax.random.PRNGKey(0)
    k_param, k_x = jax.random.split(key)

    in_channels, out_channels = 4, 8
    kernel_size, strides = 3, 2
    N, H, W = 2, 16, 16

    params = init_params(k_param, in_channels, out_channels, kernel_size)
    x = jax.random.normal(k_x, (N, H, W, in_channels), jnp.float32)

    # One-time weight prep, hoisted out of the jitted forward.
    prepared = prepare_conv2d_upsample(params, height=H, width=W,
                                       kernel_size=kernel_size, strides=strides)
    prepared = jax.device_put(prepared)

    fwd = jax.jit(functools.partial(conv2d_upsample_forward,
                                    kernel_size=kernel_size, strides=strides))
    y = jax.block_until_ready(fwd(prepared, x))

    expected = (N, H * strides, W * strides, out_channels)
    assert y.shape == expected, (y.shape, expected)
    assert bool(jnp.all(jnp.isfinite(y)))

    y_ref = _forward_ref(params, x, kernel_size=kernel_size, strides=strides)
    err = float(jnp.max(jnp.abs(y - y_ref)))
    assert err < 1e-1, f"max abs err vs reference: {err}"

    print("KERNEL_OK")
</pallas_src>

<mosaic_0001>
module attributes {stable_mosaic.version = 11 : i64} {
  func.func @kernel(%arg0: i32, %arg1: memref<1x16x64xf32, #tpu.memory_space<vmem>>, %arg2: memref<192x128xbf16, #tpu.memory_space<vmem>>, %arg3: memref<1x128xf32, #tpu.memory_space<vmem>>, %arg4: memref<32x16xbf16, #tpu.memory_space<vmem>>, %arg5: memref<384x256xbf16, #tpu.memory_space<vmem>>, %arg6: memref<1x256xf32, #tpu.memory_space<vmem>>, %arg7: memref<1x32x256xf32, #tpu.memory_space<vmem>>, %arg8: memref<16x192xbf16, #tpu.memory_space<vmem>>, %arg9: memref<32x384xbf16, #tpu.memory_space<vmem>>) attributes {dimension_semantics = [#tpu.dimension_semantics<parallel>], iteration_bounds = array<i64: 2>, scalar_prefetch = 0 : i64, scratch_operands = 2 : i64, tpu.core_type = #tpu.core_type<tc>, window_params = [{transform_indices = @transform_0, window_bounds = array<i64: 1, 16, 64>}, {pipeline_mode = #tpu.pipeline_mode<synchronous>, transform_indices = @transform_1, window_bounds = array<i64: 192, 128>}, {pipeline_mode = #tpu.pipeline_mode<synchronous>, transform_indices = @transform_2, window_bounds = array<i64: 1, 128>}, {pipeline_mode = #tpu.pipeline_mode<synchronous>, transform_indices = @transform_3, window_bounds = array<i64: 32, 16>}, {pipeline_mode = #tpu.pipeline_mode<synchronous>, transform_indices = @transform_4, window_bounds = array<i64: 384, 256>}, {pipeline_mode = #tpu.pipeline_mode<synchronous>, transform_indices = @transform_5, window_bounds = array<i64: 1, 256>}, {transform_indices = @transform_6, window_bounds = array<i64: 1, 32, 256>}]} {
    %c0 = arith.constant 0 : index
    %c0_0 = arith.constant 0 : index
    %c0_1 = arith.constant 0 : index
    %0 = vector.load %arg1[%c0, %c0_0, %c0_1] : memref<1x16x64xf32, #tpu.memory_space<vmem>>, vector<1x16x64xf32>
    %1 = vector.shape_cast %0 : vector<1x16x64xf32> to vector<16x64xf32>
    %2 = arith.truncf %1 : vector<16x64xf32> to vector<16x64xbf16>
    %3 = vector.extract_strided_slice %2 {offsets = [0, 0], sizes = [15, 64], strides = [1, 1]} : vector<16x64xbf16> to vector<15x64xbf16>
    %c1 = arith.constant 1 : index
    %c0_2 = arith.constant 0 : index
    %4 = vector.load %arg8[%c1, %c0_2] : memref<16x192xbf16, #tpu.memory_space<vmem>>, vector<15x64xbf16>
    tpu.vector_store %arg8[%c1, %c0_2], %3 {strides = array<i32>} : memref<16x192xbf16, #tpu.memory_space<vmem>>, vector<15x64xbf16>,
    %5 = vector.extract_strided_slice %2 {offsets = [0, 0], sizes = [1, 64], strides = [1, 1]} : vector<16x64xbf16> to vector<1x64xbf16>
    %c0_3 = arith.constant 0 : index
    %c0_4 = arith.constant 0 : index
    %6 = vector.load %arg8[%c0_3, %c0_4] : memref<16x192xbf16, #tpu.memory_space<vmem>>, vector<1x64xbf16>
    tpu.vector_store %arg8[%c0_3, %c0_4], %5 {strides = array<i32>} : memref<16x192xbf16, #tpu.memory_space<vmem>>, vector<1x64xbf16>,
    %c0_5 = arith.constant 0 : index
    %c64 = arith.constant 64 : index
    %7 = vector.load %arg8[%c0_5, %c64] : memref<16x192xbf16, #tpu.memory_space<vmem>>, vector<16x64xbf16>
    tpu.vector_store %arg8[%c0_5, %c64], %2 {strides = array<i32>} : memref<16x192xbf16, #tpu.memory_space<vmem>>, vector<16x64xbf16>,
    %8 = vector.extract_strided_slice %2 {offsets = [1, 0], sizes = [15, 64], strides = [1, 1]} : vector<16x64xbf16> to vector<15x64xbf16>
    %c0_6 = arith.constant 0 : index
    %c128 = arith.constant 128 : index
    %9 = vector.load %arg8[%c0_6, %c128] : memref<16x192xbf16, #tpu.memory_space<vmem>>, vector<15x64xbf16>
    tpu.vector_store %arg8[%c0_6, %c128], %8 {strides = array<i32>} : memref<16x192xbf16, #tpu.memory_space<vmem>>, vector<15x64xbf16>,
    %10 = vector.extract_strided_slice %2 {offsets = [15, 0], sizes = [1, 64], strides = [1, 1]} : vector<16x64xbf16> to vector<1x64xbf16>
    %c15 = arith.constant 15 : index
    %c128_7 = arith.constant 128 : index
    %11 = vector.load %arg8[%c15, %c128_7] : memref<16x192xbf16, #tpu.memory_space<vmem>>, vector<1x64xbf16>
    tpu.vector_store %arg8[%c15, %c128_7], %10 {strides = array<i32>} : memref<16x192xbf16, #tpu.memory_space<vmem>>, vector<1x64xbf16>,
    %c0_8 = arith.constant 0 : index
    %c0_9 = arith.constant 0 : index
    %12 = vector.load %arg8[%c0_8, %c0_9] : memref<16x192xbf16, #tpu.memory_space<vmem>>, vector<16x192xbf16>
    %c0_10 = arith.constant 0 : index
    %c0_11 = arith.constant 0 : index
    %13 = vector.load %arg2[%c0_10, %c0_11] : memref<192x128xbf16, #tpu.memory_space<vmem>>, vector<192x128xbf16>
    %cst = arith.constant dense<0.000000e+00> : vector<16x128xf32>
    %14 = tpu.matmul %12, %13, %cst {dimension_numbers = #tpu.dot_dimension_numbers<[1], [0], [0], [1], [0, 0, 1, 1], [], []>} : vector<16x192xbf16>, vector<192x128xbf16>, vector<16x128xf32> -> vector<16x128xf32>
    %c0_12 = arith.constant 0 : index
    %c0_13 = arith.constant 0 : index
    %15 = vector.load %arg3[%c0_12, %c0_13] : memref<1x128xf32, #tpu.memory_space<vmem>>, vector<1x128xf32>
    %16 = vector.broadcast %15 : vector<1x128xf32> to vector<16x128xf32>
    %17 = arith.addf %14, %16 : vector<16x128xf32>
    %c0_14 = arith.constant 0 : index
    %c0_15 = arith.constant 0 : index
    %18 = vector.load %arg4[%c0_14, %c0_15] : memref<32x16xbf16, #tpu.memory_space<vmem>>, vector<32x16xbf16>
    %19 = arith.truncf %17 : vector<16x128xf32> to vector<16x128xbf16>
    %cst_16 = arith.constant dense<0.000000e+00> : vector<32x128xf32>
    %20 = tpu.matmul %18, %19, %cst_16 {dimension_numbers = #tpu.dot_dimension_numbers<[1], [0], [0], [1], [0, 0, 1, 1], [], []>} : vector<32x16xbf16>, vector<16x128xbf16>, vector<32x128xf32> -> vector<32x128xf32>
    %21 = arith.truncf %20 : vector<32x128xf32> to vector<32x128xbf16>
    %22 = vector.extract_strided_slice %21 {offsets = [0, 0], sizes = [31, 128], strides = [1, 1]} : vector<32x128xbf16> to vector<31x128xbf16>
    %c1_17 = arith.constant 1 : index
    %c0_18 = arith.constant 0 : index
    %23 = vector.load %arg9[%c1_17, %c0_18] : memref<32x384xbf16, #tpu.memory_space<vmem>>, vector<31x128xbf16>
    tpu.vector_store %arg9[%c1_17, %c0_18], %22 {strides = array<i32>} : memref<32x384xbf16, #tpu.memory_space<vmem>>, vector<31x128xbf16>,
    %24 = vector.extract_strided_slice %21 {offsets = [0, 0], sizes = [1, 128], strides = [1, 1]} : vector<32x128xbf16> to vector<1x128xbf16>
    %c0_19 = arith.constant 0 : index
    %c0_20 = arith.constant 0 : index
    %25 = vector.load %arg9[%c0_19, %c0_20] : memref<32x384xbf16, #tpu.memory_space<vmem>>, vector<1x128xbf16>
    tpu.vector_store %arg9[%c0_19, %c0_20], %24 {strides = array<i32>} : memref<32x384xbf16, #tpu.memory_space<vmem>>, vector<1x128xbf16>,
    %c0_21 = arith.constant 0 : index
    %c128_22 = arith.constant 128 : index
    %26 = vector.load %arg9[%c0_21, %c128_22] : memref<32x384xbf16, #tpu.memory_space<vmem>>, vector<32x128xbf16>
    tpu.vector_store %arg9[%c0_21, %c128_22], %21 {strides = array<i32>} : memref<32x384xbf16, #tpu.memory_space<vmem>>, vector<32x128xbf16>,
    %27 = vector.extract_strided_slice %21 {offsets = [1, 0], sizes = [31, 128], strides = [1, 1]} : vector<32x128xbf16> to vector<31x128xbf16>
    %c0_23 = arith.constant 0 : index
    %c256 = arith.constant 256 : index
    %28 = vector.load %arg9[%c0_23, %c256] : memref<32x384xbf16, #tpu.memory_space<vmem>>, vector<31x128xbf16>
    tpu.vector_store %arg9[%c0_23, %c256], %27 {strides = array<i32>} : memref<32x384xbf16, #tpu.memory_space<vmem>>, vector<31x128xbf16>,
    %29 = vector.extract_strided_slice %21 {offsets = [31, 0], sizes = [1, 128], strides = [1, 1]} : vector<32x128xbf16> to vector<1x128xbf16>
    %c31 = arith.constant 31 : index
    %c256_24 = arith.constant 256 : index
    %30 = vector.load %arg9[%c31, %c256_24] : memref<32x384xbf16, #tpu.memory_space<vmem>>, vector<1x128xbf16>
    tpu.vector_store %arg9[%c31, %c256_24], %29 {strides = array<i32>} : memref<32x384xbf16, #tpu.memory_space<vmem>>, vector<1x128xbf16>,
    %c0_25 = arith.constant 0 : index
    %c0_26 = arith.constant 0 : index
    %31 = vector.load %arg9[%c0_25, %c0_26] : memref<32x384xbf16, #tpu.memory_space<vmem>>, vector<32x384xbf16>
    %c0_27 = arith.constant 0 : index
    %c0_28 = arith.constant 0 : index
    %32 = vector.load %arg5[%c0_27, %c0_28] : memref<384x256xbf16, #tpu.memory_space<vmem>>, vector<384x256xbf16>
    %cst_29 = arith.constant dense<0.000000e+00> : vector<32x256xf32>
    %33 = tpu.matmul %31, %32, %cst_29 {dimension_numbers = #tpu.dot_dimension_numbers<[1], [0], [0], [1], [0, 0, 1, 1], [], []>} : vector<32x384xbf16>, vector<384x256xbf16>, vector<32x256xf32> -> vector<32x256xf32>
    %c0_30 = arith.constant 0 : index
    %c0_31 = arith.constant 0 : index
    %34 = vector.load %arg6[%c0_30, %c0_31] : memref<1x256xf32, #tpu.memory_space<vmem>>, vector<1x256xf32>
    %35 = vector.broadcast %34 : vector<1x256xf32> to vector<32x256xf32>
    %36 = arith.addf %33, %35 : vector<32x256xf32>
    %c0_32 = arith.constant 0 : index
    %c0_33 = arith.constant 0 : index
    %c0_34 = arith.constant 0 : index
    %37 = vector.load %arg7[%c0_32, %c0_33, %c0_34] : memref<1x32x256xf32, #tpu.memory_space<vmem>>, vector<1x32x256xf32>
    %38 = vector.shape_cast %37 : vector<1x32x256xf32> to vector<32x256xf32>
    %39 = vector.shape_cast %36 : vector<32x256xf32> to vector<1x32x256xf32>
    tpu.vector_store %arg7[%c0_32, %c0_33, %c0_34], %39 {strides = array<i32>} : memref<1x32x256xf32, #tpu.memory_space<vmem>>, vector<1x32x256xf32>,
    return
  }
  func.func @transform_0(%arg0: i32) -> (i32, i32, i32) {
    %c0_i32 = arith.constant 0 : i32
    %c0_i32_0 = arith.constant 0 : i32
    %c0_i32_1 = arith.constant 0 : i32
    return %arg0, %c0_i32, %c0_i32_0 : i32, i32, i32
  }
  func.func @transform_1(%arg0: i32) -> (i32, i32) {
    %c0_i32 = arith.constant 0 : i32
    %c0_i32_0 = arith.constant 0 : i32
    %c0_i32_1 = arith.constant 0 : i32
    return %c0_i32, %c0_i32_0 : i32, i32
  }
  func.func @transform_2(%arg0: i32) -> (i32, i32) {
    %c0_i32 = arith.constant 0 : i32
    %c0_i32_0 = arith.constant 0 : i32
    %c0_i32_1 = arith.constant 0 : i32
    return %c0_i32, %c0_i32_0 : i32, i32
  }
  func.func @transform_3(%arg0: i32) -> (i32, i32) {
    %c0_i32 = arith.constant 0 : i32
    %c0_i32_0 = arith.constant 0 : i32
    %c0_i32_1 = arith.constant 0 : i32
    return %c0_i32, %c0_i32_0 : i32, i32
  }
  func.func @transform_4(%arg0: i32) -> (i32, i32) {
    %c0_i32 = arith.constant 0 : i32
    %c0_i32_0 = arith.constant 0 : i32
    %c0_i32_1 = arith.constant 0 : i32
    return %c0_i32, %c0_i32_0 : i32, i32
  }
  func.func @transform_5(%arg0: i32) -> (i32, i32) {
    %c0_i32 = arith.constant 0 : i32
    %c0_i32_0 = arith.constant 0 : i32
    %c0_i32_1 = arith.constant 0 : i32
    return %c0_i32, %c0_i32_0 : i32, i32
  }
  func.func @transform_6(%arg0: i32) -> (i32, i32, i32) {
    %c0_i32 = arith.constant 0 : i32
    %c0_i32_0 = arith.constant 0 : i32
    %c0_i32_1 = arith.constant 0 : i32
    return %arg0, %c0_i32, %c0_i32_0 : i32, i32, i32
  }
}

</mosaic_0001>

<bundles_post_ra>
// kernel: conv2d_upsample_forward.1
= control target key start
LH: loop header
LB: loop body
LE: loop exit
PB: predicated region body
PF: predicated region fallthrough
CT: control target
= control target key end

     0   :  { %11 = vsyncpa [#allocation5], 0  ;;  %s1510_s21 = smov 0   ;;  %s1825_s0 = inlined_call_operand.vmem [shape: f32[2,16,64], index: 0, kind: input, shape index: {}]   ;;  %s1826_s1 = inlined_call_operand.hbm [shape: bf16[192,128], index: 1, kind: input, shape index: {}]   ;;  %s1827_s2 = inlined_call_operand.vmem [shape: f32[1,128], index: 2, kind: input, shape index: {}]   ;;  %s1828_s3 = inlined_call_operand.vmem [shape: bf16[32,16], index: 3, kind: input, shape index: {}]   ;;  %s1829_s4 = inlined_call_operand.vmem [shape: bf16[384,256], index: 4, kind: input, shape index: {}]   ;;  %s1830_s5 = inlined_call_operand.vmem [shape: f32[1,256], index: 5, kind: input, shape index: {}]   ;;  %s1831_s6 = inlined_call_operand.vmem [shape: f32[2,32,256], index: 6, kind: output, shape index: {}]  }
   0x1 LB: > { %s1202_s22 = sadd.s32 4294967295, %s1468_s21   ;;  %p1204_p0 = scmp.ge.s32.totalorder %s1468_s21, 1  ;;  %s1468_s21 = sphi %s1510_s21, %s17_s21  }
   0x2   : > { %p179_p1 = scmp.lt.s32.totalorder %s1468_s21, 3  ;;  %s1470_s23 = smov [#allocation4]  }
   0x3   : > { %s191_s24 = sshll.u32 %s1470_s23, 4  ;;  %p1320_p3 = scmp.eq.s32.totalorder %s1202_s22, 0  ;;  %s192_s24 = int_to_ptr.vmem [resolvable:$true] %s191_s24 }
   0x4   : > { %p1518_p2 = pnand %p1204_p0, %p179_p1  ;;  %s1443_s26 = scalar_lea.vmem %s192_s24, 1536 }
   0x5   : > { %p1444_p7 = scmp.ne.s32.totalorder %s192_s24, %s1443_s26  ;;  %p1451_p10 = scmp.lt.s32.totalorder %s192_s24, %s192_s24 }
   0x6   : > { %p1316_p4 = pneg %p1518_p2  ;;  %p1452_p11 = scmp.lt.s32.totalorder %s1443_s26, %s1443_s26 }
   0x8   : > { %p1317_p5 = pnand %p1320_p3, %p1316_p4  ;;  %p1453_p12 = por %p1452_p11, %p1451_p10 }
   0xa   : > { %p1434_p6 = pneg %p1317_p5 }
   0xc   : > { %p1446_p8 = pnand %p1444_p7, %p1434_p6 }
   0xe   : > { %p1447_p9 = pneg %p1446_p8 }
  0x10   : > { %p1454_p13 = pnand %p1453_p12, %p1447_p9 }
  0x12   : > { %1457 = shalt.err (!%p1454_p13)
}
  0x13   : > { %s1471_s27 = smov 64   ;;  %s1472_s28 = smov 4  }
  0x14   : > { %1319 = dma.hbm_to_vmem [thread:$0]  (!%p1317_p5), %s1826_s1, 1536, %s192_s24, [#allocation5], %s1471_s27, %s1471_s27, %s1472_s28  }
  0x15   : > { %227 = sbr.rel (%p1518_p2) target bundleno = 800 (0x320), region = 44 }
  0x1a   : > { %1463 = dma.done.wait (%p1320_p3), [#allocation5], 1536  }
  0x1b   : > { %1465 = vsyncadd (%p1320_p3), [#allocation5], 4294965760  ;;  %p257_p0 = scmp.lt.s32.totalorder %s1202_s22, 1  ;;  %v1473_v0 = vmov 0   ;;  %vm298_vm0 = vsmask.f32 7938 }
  0x1c   : > { %463 = vmatprep.subr.bf16.mxu0 %v1473_v0  ;;  %vm276_vm1 = vsmask.f32 256  ;;  %vm319_vm2 = vsmask.f32 3328  ;;  %vm320_vm3 = vsmask.f32 7440 }
  0x1d   : > { %s1846_s22 = smov (!%p257_p0, %s1202_s22), 1  ;;  %vm277_vm4 = vsmask.f32 4368  ;;  %vm297_vm5 = vcmask 519168   ;;  %v1335_v5 = vld [vmem:[#allocation4 + $0x38] sm:$0xff]   ;;  %s1474_s11 = smov 64   ;;  %vm1560_vm7 = vmor %vm319_vm2, %vm320_vm3 }
  0x1e   : > { %s1295_s7 = sshll.u32 %s1846_s22, 4  ;;  %v1336_v10 = vld [vmem:[#allocation4 + $0x30] sm:$0xff]   ;;  %v300_v11 = vld [vmem:[#allocation2] sm:$0xf]  ;;  %464 = vmatpush1.bf16.msra.mxu0 %v1335_v5  ;;  %vm1553_vm6 = vmand %vm297_vm5, %vm298_vm0  ;;  %vm305_vm9 = vcmask 516096   ;;  %vm339_vm11 = vcmask 519171  }
  0x1f   : > { %s261_s10 = scalar_lea.vmem %s1825_s0, %s1295_s7  ;;  %465 = vmatprep.subr.bf16.mxu0 %v1473_v0  ;;  %v335_v21 = vld [vmem:[#allocation2 + $0xc] sm:$0xf]  ;;  %vm1567_vm8 = vmand %vm297_vm5, %vm319_vm2  ;;  %vm340_vm12 = vsmask.f32 7950  ;;  %v1338_v34 = vld [vmem:[#allocation4 + $0x20] sm:$0xff]   ;;  %vm316_vm15 = vcmask 1043968  }
  0x20   : > { %v1539_v1 = vld [vmem:[%s261_s10] sm:$0xff]  ;;  %v1541_v2 = vld [vmem:[%s261_s10 + $0x8] sm:$0xff]  ;;  %vm1576_vm10 = vmor %vm276_vm1, %vm277_vm4  ;;  %vm459_vm3 = vcmask 523264   ;;  %vm519_vm4 = vcmask 130048   ;;  %s1296_s30 = sshll.u32 %s1846_s22, 6 }
  0x21   : > { %v1297_v3 = vpack.c.bf16 %v1539_v1, %v1539_v1  ;;  %v1547_v4 = vpack.c.bf16 %v1541_v2, %v1541_v2  ;;  %v1337_v22 = vld [vmem:[#allocation4 + $0x28] sm:$0xff]   ;;  %vm306_vm13 = vmand %vm305_vm9, %vm276_vm1  ;;  %v270_v36 = vpack.c.bf16 %v1541_v2, %v1539_v1  ;;  %v1339_v37 = vld [vmem:[#allocation4 + $0x18] sm:$0xff]   ;;  %vm676_vm9 = vcmask 1043459   ;;  %s1812_s9 = scalar_lea.vmem %s1831_s6, %s1296_s30 }
  0x22   : > { %466 = vmatpush1.bf16.msra.mxu0 %v1336_v10  ;;  %vm341_vm14 = vmand %vm339_vm11, %vm340_vm12  ;;  %v1340_v40 = vld [vmem:[#allocation4 + $0x10] sm:$0xff]   ;;  %v1341_v43 = vld [vmem:[#allocation4 + $0x8] sm:$0xff]  }
  0x23   : > { %310 = vrot.lane.b32.xlu0 %v1297_v3, %s1474_s11  ;;  %v280_v6 = vshrl.u32 %v1297_v3, 16  ;;  %v283_v7 = vshll.u32 %v1297_v3, 16  ;;  %v288_v8 = vshrl.u32 %v1547_v4, 16  ;;  %v291_v9 = vshll.u32 %v1547_v4, 16  ;;  %467 = vmatprep.subr.bf16.mxu0 %v1473_v0  ;;  %v1342_v44 = vld [vmem:[#allocation4] sm:$0xff]   ;;  %v1343_v45 = vld [vmem:[#allocation4 + $0x58] sm:$0xff]  }
  0x24   : > { %v1344_v46 = vld [vmem:[#allocation4 + $0x50] sm:$0xff]   ;;  %v1345_v47 = vld [vmem:[#allocation4 + $0x48] sm:$0xff]   ;;  %v1346_v48 = vld [vmem:[#allocation4 + $0x40] sm:$0xff]  }
  0x25   : > { %v282_v13 = vrot.slane %v280_v6, 7  ;;  %v322_v14 = vrot.slane %v280_v6, 4  ;;  %v323_v15 = vrot.slane %v283_v7, 5  ;;  %v326_v16 = vrot.slane %v291_v9, 5  ;;  %v1350_v53 = vld [vmem:[%s1828_s3] sm:$0xff]   ;;  %v1351_v2 = vld [vmem:[%s1828_s3 + $0x8] sm:$0xff]  }
  0x26   : > { %v328_v18 = vrot.slane %v288_v8, 4  ;;  %v290_v26 = vrot.slane %v288_v8, 7  ;;  %468 = vmatpush1.bf16.msra.mxu0 %v1337_v22  ;;  %1308 = vmatprep.mubr.msk.bf16.mxu1 %vm519_vm4, %v1350_v53  ;;  %v1376_v54 = vld [vmem:[%s1829_s4 + $0x170] ss:$8 sps:$4 sm:$0xff]   ;;  %v1378_v55 = vld [vmem:[%s1829_s4 + $0x174] ss:$8 sps:$4 sm:$0xff]  }
  0x27   : > { %v285_v19 = vor.u32 %v283_v7, %v282_v13  ;;  %v324_v20 = vor.u32 %v323_v15, %v322_v14  ;;  %312 = vrot.lane.b32.xlu0 %v1547_v4, %s1474_s11  ;;  %v286_v23 = vrot.slane %v282_v13, 4  ;;  %469 = vmatprep.subr.bf16.mxu0 %v1473_v0  ;;  %v1215_v57 = vld [vmem:[%s1827_s2] ss:$0 sm:$0xff]  ;;  %v1354_v1 = vld [vmem:[%s1829_s4 + $0x74] ss:$8 sps:$4 sm:$0xff]  }
  0x28   : > { %v329_v24 = vor.u32 %v328_v18, %v326_v16  ;;  %v293_v31 = vor.u32 %v291_v9, %v290_v26  ;;  %v1352_v3 = vld [vmem:[%s1829_s4 + $0x70] ss:$8 sps:$4 sm:$0xff]   ;;  %v1355_v5 = vld [vmem:[%s1829_s4 + $0x60] ss:$8 sps:$4 sm:$0xff]   ;;  %v1360_v6 = vld [vmem:[%s1829_s4 + $0x54] ss:$8 sps:$4 sm:$0xff]  }
  0x29   : > { %v301_v27 = vsel %vm1553_vm6, %v285_v19, %v300_v11  ;;  %v325_v28 = vrot.slane %v324_v20, 4  ;;  %v1358_v7 = vld [vmem:[%s1829_s4 + $0x50] ss:$8 sps:$4 sm:$0xff]   ;;  %v1363_v8 = vld [vmem:[%s1829_s4 + $0x44] ss:$8 sps:$4 sm:$0xff]  }
  0x2a   : > { %302 = vst [vmem:[#allocation2] sm:$0xf] %v301_v27  ;;  %v330_v30 = vrot.slane %v329_v24, 4  ;;  %v294_v35 = vsel %vm1576_vm10, %v286_v23, %v293_v31  ;;  %470 = vmatpush1.bf16.msra.mxu0 %v1338_v34  ;;  %v1361_v9 = vld [vmem:[%s1829_s4 + $0x40] ss:$8 sps:$4 sm:$0xff]  }
  0x2b   : > { %v327_v32 = vsel %vm1560_vm7, %v325_v28, %v326_v16  ;;  %304 = vst.msk [vmem:[#allocation2 + $0x8] sm:$0xf] %vm297_vm5, %v294_v35  ;;  %471 = vmatprep.subr.bf16.mxu0 %v1473_v0  ;;  %v1366_v10 = vld [vmem:[%s1829_s4 + $0x34] ss:$8 sps:$4 sm:$0xff]   ;;  %v1364_v11 = vld [vmem:[%s1829_s4 + $0x30] ss:$8 sps:$4 sm:$0xff]  }
  0x2c   : > { %v336_v33 = vsel %vm1567_vm8, %v330_v30, %v335_v21  ;;  %333 = vst.msk [vmem:[#allocation2 + $0x4] sm:$0xf] %vm297_vm5, %v327_v32  ;;  %v1369_v12 = vld [vmem:[%s1829_s4 + $0x24] ss:$8 sps:$4 sm:$0xff]   ;;  %v1367_v13 = vld [vmem:[%s1829_s4 + $0x20] ss:$8 sps:$4 sm:$0xff]  }
  0x2d   : > { %337 = vst [vmem:[#allocation2 + $0xc] sm:$0xf] %v336_v33  ;;  %v1372_v14 = vld [vmem:[%s1829_s4 + $0x14] ss:$8 sps:$4 sm:$0xff]   ;;  %v1370_v15 = vld [vmem:[%s1829_s4 + $0x10] ss:$8 sps:$4 sm:$0xff]  }
  0x2e   : > { %472 = vmatpush1.bf16.msra.mxu0 %v1339_v37  ;;  %v1375_v16 = vld [vmem:[%s1829_s4 + $0x4] ss:$8 sps:$4 sm:$0xff]   ;;  %v1373_v18 = vld [vmem:[%s1829_s4] ss:$8 sps:$4 sm:$0xff]   ;;  %v1381_v19 = vld [vmem:[%s1829_s4 + $0xf4] ss:$8 sps:$4 sm:$0xff]  }
  0x2f   : > { %473 = vmatprep.subr.bf16.mxu0 %v1473_v0  ;;  %v1384_v20 = vld [vmem:[%s1829_s4 + $0x164] ss:$8 sps:$4 sm:$0xff]   ;;  %v1379_v21 = vld [vmem:[%s1829_s4 + $0xf0] ss:$8 sps:$4 sm:$0xff]   ;;  %v1382_v22 = vld [vmem:[%s1829_s4 + $0x160] ss:$8 sps:$4 sm:$0xff]  }
  0x30   : > { %v1387_v23 = vld [vmem:[%s1829_s4 + $0xe4] ss:$8 sps:$4 sm:$0xff]   ;;  %v1390_v24 = vld [vmem:[%s1829_s4 + $0x154] ss:$8 sps:$4 sm:$0xff]   ;;  %v1385_v25 = vld [vmem:[%s1829_s4 + $0xe0] ss:$8 sps:$4 sm:$0xff]  }
  0x31   : > { %v307_v38 = vld [vmem:[#allocation2] sm:$0x1]  ;;  %v1388_v26 = vld [vmem:[%s1829_s4 + $0x150] ss:$8 sps:$4 sm:$0xff]   ;;  %v1393_v27 = vld [vmem:[%s1829_s4 + $0xd4] ss:$8 sps:$4 sm:$0xff]  }
  0x32   : > { %v308_v39 = vsel %vm306_vm13, %v270_v36, %v307_v38  ;;  %474 = vmatpush1.bf16.msra.mxu0 %v1340_v40  ;;  %v1391_v28 = vld [vmem:[%s1829_s4 + $0xd0] ss:$8 sps:$4 sm:$0xff]   ;;  %v1394_v30 = vld [vmem:[%s1829_s4 + $0x140] ss:$8 sps:$4 sm:$0xff]   ;;  %v1396_v31 = vld [vmem:[%s1829_s4 + $0x144] ss:$8 sps:$4 sm:$0xff]  }
  0x33   : > { %309 = vst [vmem:[#allocation2] sm:$0x1] %v308_v39  ;;  %475 = vmatprep.subr.bf16.mxu0 %v1473_v0  ;;  %v1399_v32 = vld [vmem:[%s1829_s4 + $0xc4] ss:$8 sps:$4 sm:$0xff]   ;;  %v1402_v33 = vld [vmem:[%s1829_s4 + $0x134] ss:$8 sps:$4 sm:$0xff]  }
  0x34   : > { %v342_v41 = vld [vmem:[#allocation2 + $0xc] sm:$0x8]  ;;  %v1397_v34 = vld [vmem:[%s1829_s4 + $0xc0] ss:$8 sps:$4 sm:$0xff]   ;;  %v1400_v35 = vld [vmem:[%s1829_s4 + $0x130] ss:$8 sps:$4 sm:$0xff]  }
  0x35   : > { %v343_v42 = vsel %vm341_vm14, %v1547_v4, %v342_v41  ;;  %v1357_v4 = vld [vmem:[%s1829_s4 + $0x64] ss:$8 sps:$4 sm:$0xff]   ;;  %v1405_v36 = vld [vmem:[%s1829_s4 + $0xb4] ss:$8 sps:$4 sm:$0xff]   ;;  %v1403_v38 = vld [vmem:[%s1829_s4 + $0xb0] ss:$8 sps:$4 sm:$0xff]  }
  0x36   : > { %344 = vst [vmem:[#allocation2 + $0xc] sm:$0x8] %v343_v42  ;;  %476 = vmatpush1.bf16.msra.mxu0 %v1341_v43  ;;  %v1408_v37 = vld [vmem:[%s1829_s4 + $0x124] ss:$8 sps:$4 sm:$0xff]   ;;  %v1406_v39 = vld [vmem:[%s1829_s4 + $0x120] ss:$8 sps:$4 sm:$0xff]  }
  0x37   : > { %477 = vmatprep.subr.bf16.mxu0 %v1473_v0  ;;  %v1411_v40 = vld [vmem:[%s1829_s4 + $0xa4] ss:$8 sps:$4 sm:$0xff]   ;;  %v1414_v41 = vld [vmem:[%s1829_s4 + $0x114] ss:$8 sps:$4 sm:$0xff]   ;;  %v1409_v42 = vld [vmem:[%s1829_s4 + $0xa0] ss:$8 sps:$4 sm:$0xff]  }
  0x38   : > { %v1412_v43 = vld [vmem:[%s1829_s4 + $0x110] ss:$8 sps:$4 sm:$0xff]   ;;  %vm625_vm5 = vcmask 1043456   ;;  %vm633_vm8 = vcmask 1040384  }
  0x39   : > { %vm1770_vm6 = vmand %vm625_vm5, %vm298_vm0 }
  0x3a   : > { %478 = vmatpush1.bf16.msra.mxu0 %v1342_v44  ;;  %v1417_v44 = vld [vmem:[%s1829_s4 + $0x94] ss:$8 sps:$4 sm:$0xff]   ;;  %vm1783_vm0 = vmand %vm625_vm5, %vm319_vm2 }
  0x3b   : > { %487 = vmatprep.subr.bf16.mxu0 %v1473_v0  ;;  %vm634_vm2 = vmand %vm633_vm8, %vm276_vm1 }
  0x3c   : > { %vm677_vm1 = vmand %vm676_vm9, %vm340_vm12 }
  0x3d   : > { %v1349_v52 = vld [vmem:[#allocation2 + $0x4] ss:$8 sps:$4 sm:$0xff]  }
  0x3e   : > { %488 = vmatpush2.bf16.msra.mxu0 %v1343_v45  ;;  %1230 = vmatprep.mubr.msk.bf16.mxu0 %vm459_vm3, %v1349_v52  ;;  %v1420_v45 = vld [vmem:[%s1829_s4 + $0x104] ss:$8 sps:$4 sm:$0xff]  }
  0x3f   : > { %489 = vmatprep.subr.bf16.mxu0 %v1473_v0 }
  0x42   : > { %490 = vmatpush2.bf16.msra.mxu0 %v1344_v46  ;;  %v1415_v46 = vld [vmem:[%s1829_s4 + $0x90] ss:$8 sps:$4 sm:$0xff]  }
  0x43   : > { %491 = vmatprep.subr.bf16.mxu0 %v1473_v0 }
  0x46   : > { %492 = vmatpush2.bf16.msra.mxu0 %v1345_v47  ;;  %v1418_v47 = vld [vmem:[%s1829_s4 + $0x100] ss:$8 sps:$4 sm:$0xff]  }
  0x47   : > { %493 = vmatprep.subr.bf16.mxu0 %v1473_v0 }
  0x4a   : > { %494 = vmatpush2.bf16.msra.mxu0 %v1346_v48  ;;  %v1423_v48 = vld [vmem:[%s1829_s4 + $0x84] ss:$8 sps:$4 sm:$0xff]  }
  0x4b   : > { %1074 = vmatprep.subr.bf16.mxu0 %v1378_v55 }
  0x95   : > { %v311_v49 = vpop.permute.xlu0 %310 }
  0x96   : > { %317 = vst.msk [vmem:[#allocation2] sm:$0xf] %vm316_vm15, %v311_v49  ;;  %v1421_v49 = vld [vmem:[%s1829_s4 + $0x80] ss:$8 sps:$4 sm:$0xff]  }
  0x99   : > { %v313_v50 = vpop.permute.xlu0 %312 }
  0x9a   : > { %318 = vst.msk [vmem:[#allocation2 + $0x8] sm:$0xf] %vm316_vm15, %v313_v50 }
  0xa1   : > { %v1347_v51 = vld [vmem:[#allocation2] ss:$8 sps:$4 sm:$0xff]  }
  0xa2   : > { %496 = vmatmul.mubr.bf16.vlgmr.msra.gmra.mxu0 %v1347_v51 }
  0xa3   : > { %1106 = vmatprep.mubr.bf16.mxu0 %v1473_v0  ;;  %1075 = vmatpush1.bf16.msra.mxu0 %v1376_v54 }
  0xa4   : > { %1076 = vmatprep.subr.bf16.mxu0 %v1384_v20 }
  0xa7   : > { %1077 = vmatpush1.bf16.msra.mxu0 %v1382_v22 }
  0xa8   : > { %1078 = vmatprep.subr.bf16.mxu0 %v1390_v24  ;;  %v673_v24 = vld [vmem:[#allocation3 + $0x2c] sm:$0xf] }
  0xab   : > { %1079 = vmatpush1.bf16.msra.mxu0 %v1388_v26 }
  0xac   : > { %1080 = vmatprep.subr.bf16.mxu0 %v1396_v31 }
  0xaf   : > { %1081 = vmatpush1.bf16.msra.mxu0 %v1394_v30 }
  0xb0   : > { %1082 = vmatprep.subr.bf16.mxu0 %v1402_v33 }
  0xb3   : > { %1083 = vmatpush1.bf16.msra.mxu0 %v1400_v35 }
  0xb4   : > { %1084 = vmatprep.subr.bf16.mxu0 %v1408_v37 }
  0xb7   : > { %1085 = vmatpush1.bf16.msra.mxu0 %v1406_v39 }
  0xb8   : > { %1086 = vmatprep.subr.bf16.mxu0 %v1414_v41 }
  0xbb   : > { %1087 = vmatpush1.bf16.msra.mxu0 %v1412_v43 }
  0xbc   : > { %1088 = vmatprep.subr.bf16.mxu0 %v1420_v45 }
  0xbf   : > { %1089 = vmatpush1.bf16.msra.mxu0 %v1418_v47 }
 0x162   : > { %v497_v56 = vpop.f32.mrf.mxu0 }
 0x163   : > { %v498_v60 = vadd.f32 %v1215_v57, %v497_v56 }
 0x164   : > { %v499_v58 = vpop.f32.mrf.mxu0 }
 0x166   : > { %v500_v59 = vpop.f32.mrf.mxu0 }
 0x167   : > { %v501_v61 = vadd.f32 %v1215_v57, %v500_v59 }
 0x168   : > { %v502_v62 = vpop.f32.mrf.mxu0 }
 0x169   : > { %v508_v63 = vpack.c.bf16 %v501_v61, %v498_v60 }
 0x16b   : > { %1306 = vmatprep.subr.bf16.mxu1 %v508_v63 }
 0x16c   : > { %1307 = vmatpush3.bf16.msra.mxu1 %v508_v63 }
 0x16d   : > { %1021 = vmatprep.subr.bf16.mxu1 %v1354_v1 }
 0x16f   : > { %1309 = vmatmul.mubr.msk.bf16.vlgmr.msra.gmra.mxu1 %vm519_vm4, %v1351_v2 }
 0x170   : > { %1022 = vmatpush1.bf16.msra.mxu1 %v1352_v3  ;;  %v627_v3 = vld [vmem:[#allocation3] sm:$0xf] }
 0x171   : > { %1023 = vmatprep.subr.bf16.mxu1 %v1357_v4 }
 0x174   : > { %1024 = vmatpush1.bf16.msra.mxu1 %v1355_v5 }
 0x175   : > { %1025 = vmatprep.subr.bf16.mxu1 %v1360_v6 }
 0x178   : > { %1026 = vmatpush1.bf16.msra.mxu1 %v1358_v7 }
 0x179   : > { %1027 = vmatprep.subr.bf16.mxu1 %v1363_v8 }
 0x17c   : > { %1028 = vmatpush1.bf16.msra.mxu1 %v1361_v9 }
 0x17d   : > { %1029 = vmatprep.subr.bf16.mxu1 %v1366_v10 }
 0x180   : > { %1030 = vmatpush1.bf16.msra.mxu1 %v1364_v11 }
 0x181   : > { %1031 = vmatprep.subr.bf16.mxu1 %v1369_v12 }
 0x184   : > { %1032 = vmatpush1.bf16.msra.mxu1 %v1367_v13 }
 0x185   : > { %1033 = vmatprep.subr.bf16.mxu1 %v1372_v14 }
 0x188   : > { %1034 = vmatpush1.bf16.msra.mxu1 %v1370_v15 }
 0x189   : > { %1035 = vmatprep.subr.bf16.mxu1 %v1375_v16 }
 0x18c   : > { %1036 = vmatpush1.bf16.msra.mxu1 %v1373_v18 }
 0x18d   : > { %1037 = vmatprep.subr.bf16.mxu1 %v1381_v19 }
 0x190   : > { %1038 = vmatpush2.bf16.msra.mxu1 %v1379_v21 }
 0x191   : > { %1039 = vmatprep.subr.bf16.mxu1 %v1387_v23 }
 0x194   : > { %1040 = vmatpush2.bf16.msra.mxu1 %v1385_v25 }
 0x195   : > { %1041 = vmatprep.subr.bf16.mxu1 %v1393_v27 }
 0x198   : > { %1042 = vmatpush2.bf16.msra.mxu1 %v1391_v28 }
 0x199   : > { %1043 = vmatprep.subr.bf16.mxu1 %v1399_v32 }
 0x19c   : > { %1044 = vmatpush2.bf16.msra.mxu1 %v1397_v34 }
 0x19d   : > { %1045 = vmatprep.subr.bf16.mxu1 %v1405_v36 }
 0x1a0   : > { %1046 = vmatpush2.bf16.msra.mxu1 %v1403_v38 }
 0x1a1   : > { %1047 = vmatprep.subr.bf16.mxu1 %v1411_v40 }
 0x1a4   : > { %1048 = vmatpush2.bf16.msra.mxu1 %v1409_v42 }
 0x1a5   : > { %1049 = vmatprep.subr.bf16.mxu1 %v1417_v44 }
 0x1a8   : > { %1050 = vmatpush2.bf16.msra.mxu1 %v1415_v46 }
 0x1a9   : > { %1051 = vmatprep.subr.bf16.mxu1 %v1423_v48 }
 0x1ac   : > { %1052 = vmatpush2.bf16.msra.mxu1 %v1421_v49 }
 0x22f   : > { %v1310_v50 = vpop.f32.mrf.mxu1 }
 0x230   : > { %v1301_v51 = vpack.c.bf16 %v1310_v50, %v1310_v50 }
 0x231   : > { %v1759_v52 = vpop.f32.mrf.mxu1 }
 0x232   : > { %v605_v53 = vshrl.u32 %v1301_v51, 16  ;;  %v608_v54 = vshll.u32 %v1301_v51, 16  ;;  %644 = vst [vmem:[#allocation3 + $0x1c] sm:$0xf] %v1301_v51  ;;  %v1299_v55 = vpack.c.bf16 %v1759_v52, %v1759_v52 }
 0x233   : > { %v1311_v56 = vpop.f32.mrf.mxu1 }
 0x234   : > { %v1763_v57 = vrot.slane %v608_v54, 5  ;;  %v657_v58 = vrot.slane %v605_v53, 4  ;;  %v588_v59 = vshrl.u32 %v1299_v55, 16  ;;  %642 = vst [vmem:[#allocation3 + $0x4] sm:$0xf] %v1299_v55  ;;  %v591_v60 = vshll.u32 %v1299_v55, 16 }
 0x235   : > { %v1765_v61 = vpack.c.bf16 %v1311_v56, %v1311_v56  ;;  %v607_v62 = vrot.slane %v605_v53, 7  ;;  %v563_v8 = vpop.f32.mrf.mxu1  ;;  %v739_v53 = vlaneseq  ;;  %v737_v56 = vld [vmem:[%s1830_s5] sm:$0x3] }
 0x236   : > { %v658_v63 = vor.u32 %v657_v58, %v1763_v57  ;;  %v590_v1 = vrot.slane %v588_v59, 7  ;;  %v646_v4 = vrot.slane %v588_v59, 4  ;;  %v647_v5 = vrot.slane %v591_v60, 5 }
 0x237   : > { %v614_v6 = vshrl.u32 %v1765_v61, 16  ;;  %v617_v7 = vshll.u32 %v1765_v61, 16  ;;  %645 = vst [vmem:[#allocation3 + $0x28] sm:$0xf] %v1765_v61  ;;  %v1300_v16 = vpack.c.bf16 %v563_v8, %v563_v8  ;;  %v612_v18 = vrot.slane %v607_v62, 4 }
 0x238   : > { %v659_v9 = vrot.slane %v658_v63, 4  ;;  %v593_v10 = vor.u32 %v591_v60, %v590_v1  ;;  %v648_v11 = vor.u32 %v647_v5, %v646_v4  ;;  %v610_v33 = vor.u32 %v608_v54, %v607_v62 }
 0x239   : > { %v616_v12 = vrot.slane %v614_v6, 7  ;;  %v660_v13 = vrot.slane %v617_v7, 5  ;;  %v662_v14 = vrot.slane %v614_v6, 4  ;;  %v596_v25 = vshrl.u32 %v1300_v16, 16  ;;  %643 = vst [vmem:[#allocation3 + $0x10] sm:$0xf] %v1300_v16 }
 0x23a   : > { %v628_v15 = vsel %vm1770_vm6, %v593_v10, %v627_v3  ;;  %v649_v22 = vrot.slane %v648_v11, 4  ;;  %v599_v26 = vshll.u32 %v1300_v16, 16  ;;  %v594_v34 = vrot.slane %v590_v1, 4 }
 0x23b   : > { %629 = vst [vmem:[#allocation3] sm:$0xf] %v628_v15  ;;  %v619_v19 = vor.u32 %v617_v7, %v616_v12  ;;  %v661_v20 = vsel %vm1560_vm7, %v659_v9, %v660_v13  ;;  %v663_v21 = vor.u32 %v662_v14, %v660_v13  ;;  %v598_v30 = vrot.slane %v596_v25, 7 }
 0x23c   : > { %671 = vst [vmem:[#allocation3 + $0x20] sm:$0xf] %v661_v20  ;;  %v650_v31 = vrot.slane %v599_v26, 5  ;;  %v652_v32 = vrot.slane %v596_v25, 4  ;;  %v575_v40 = vpack.c.bf16 %v563_v8, %v1759_v52  ;;  %v740_v54 = vshrl.u32 %v739_v53, 7 }
 0x23d   : > { %v620_v27 = vsel %vm1576_vm10, %v612_v18, %v619_v19  ;;  %v664_v28 = vrot.slane %v663_v21, 4  ;;  %v601_v36 = vor.u32 %v599_v26, %v598_v30  ;;  %v603_v37 = vrot.slane %v598_v30, 4 }
 0x23e   : > { %632 = vst [vmem:[#allocation3 + $0x24] sm:$0xf] %v620_v27  ;;  %v651_v38 = vsel %vm1560_vm7, %v649_v22, %v650_v31  ;;  %v653_v39 = vor.u32 %v652_v32, %v650_v31  ;;  %v1428_v51 = vld [vmem:[#allocation3 + $0x1c] ss:$12 sps:$4 sm:$0xff]   ;;  %v741_v55 = vsub.s32 0, %v740_v54 }
 0x23f   : > { %v674_v35 = vsel %vm1783_vm0, %v664_v28, %v673_v24  ;;  %669 = vst [vmem:[#allocation3 + $0x8] sm:$0xf] %v651_v38  ;;  %v602_v41 = vsel %vm1576_vm10, %v594_v34, %v601_v36  ;;  %v611_v42 = vsel %vm1576_vm10, %v603_v37, %v610_v33 }
 0x240   : > { %675 = vst [vmem:[#allocation3 + $0x2c] sm:$0xf] %v674_v35  ;;  %v654_v44 = vrot.slane %v653_v39, 4  ;;  %630 = vst [vmem:[#allocation3 + $0xc] sm:$0xf] %v602_v41  ;;  %v742_v58 = vrot.slane %v737_v56, %v741_v55 }
 0x241   : > { %631 = vst [vmem:[#allocation3 + $0x18] sm:$0xf] %v611_v42  ;;  %v1427_v29 = vld [vmem:[#allocation3 + $0x4] ss:$12 sps:$4 sm:$0xff]  }
 0x242   : > { %v635_v43 = vld [vmem:[#allocation3] sm:$0x1]  ;;  %v656_v46 = vsel %vm1560_vm7, %v654_v44, %v1763_v57  ;;  %1053 = vmatprep.mubr.bf16.mxu1 %v1427_v29  ;;  %v745_v57 = vsub.s32 1, %v740_v54 }
 0x243   : > { %v636_v45 = vsel %vm634_vm2, %v575_v40, %v635_v43  ;;  %670 = vst [vmem:[#allocation3 + $0x14] sm:$0xf] %v656_v46 }
 0x244   : > { %637 = vst [vmem:[#allocation3] sm:$0x1] %v636_v45  ;;  %v746_v59 = vrot.slane %v737_v56, %v745_v57 }
 0x247   : > { %v678_v47 = vld [vmem:[#allocation3 + $0x2c] sm:$0x8] }
 0x248   : > { %v679_v48 = vsel %vm677_vm1, %v1765_v61, %v678_v47  ;;  %v1431_v52 = vld [vmem:[#allocation3 + $0x18] ss:$12 sps:$4 sm:$0xff]  }
 0x249   : > { %680 = vst [vmem:[#allocation3 + $0x2c] sm:$0x8] %v679_v48 }
 0x24a   : > { %v1424_v50 = vld [vmem:[#allocation3 + $0x8] ss:$12 sps:$4 sm:$0xff]  }
 0x24b   : > { %v1425_v49 = vld [vmem:[#allocation3] ss:$12 sps:$4 sm:$0xff]   ;;  %1107 = vmatmul.mubr.bf16.vlgmr.msra.gmra.mxu0 %v1424_v50 }
 0x24c   : > { %1054 = vmatmul.mubr.bf16.vlgmr.msra.gmra.mxu1 %v1425_v49  ;;  %1116 = vmatprep.mubr.bf16.mxu0 %v1473_v0 }
 0x24d   : > { %1063 = vmatprep.mubr.bf16.mxu1 %v1428_v51 }
 0x250   : > { %v1430_v17 = vld [vmem:[#allocation3 + $0x20] ss:$12 sps:$4 sm:$0xff]  }
 0x253   : > { %1117 = vmatmul.mubr.bf16.gmra.mxu0 %v1430_v17 }
 0x254   : > { %1064 = vmatmul.mubr.bf16.gmra.mxu1 %v1431_v52 }
 0x30b   : > { %v1108_v60 = vpop.f32.mrf.mxu0 }
 0x30c   : > { %v1055_v61 = vpop.f32.mrf.mxu1 }
 0x30d   : > { %v1056_v62 = vadd.f32 %v1055_v61, %v742_v58  ;;  %v1110_v0 = vpop.f32.mrf.mxu0 }
 0x30e   : > { %v1057_v63 = vpop.f32.mrf.mxu1 }
 0x30f   : > { %v1109_v1 = vadd.f32 %v1108_v60, %v1056_v62  ;;  %v1058_v2 = vadd.f32 %v1057_v63, %v746_v59  ;;  %v1112_v3 = vpop.f32.mrf.mxu0 }
 0x310   : > { %v1059_v4 = vpop.f32.mrf.mxu1 }
 0x311   : > { %1127 = vst [vmem:[%s1812_s9] sm:$0xff] %v1109_v1  ;;  %v1111_v5 = vadd.f32 %v1110_v0, %v1058_v2  ;;  %v1060_v6 = vadd.f32 %v1059_v4, %v742_v58  ;;  %v1114_v7 = vpop.f32.mrf.mxu0 }
 0x312   : > { %v1061_v8 = vpop.f32.mrf.mxu1 }
 0x313   : > { %1128 = vst [vmem:[%s1812_s9 + $0x8] sm:$0xff] %v1111_v5  ;;  %v1113_v9 = vadd.f32 %v1112_v3, %v1060_v6  ;;  %v1062_v10 = vadd.f32 %v1061_v8, %v746_v59  ;;  %v1118_v11 = vpop.f32.mrf.mxu0 }
 0x314   : > { %v1065_v12 = vpop.f32.mrf.mxu1 }
 0x315   : > { %1129 = vst [vmem:[%s1812_s9 + $0x10] sm:$0xff] %v1113_v9  ;;  %v1115_v13 = vadd.f32 %v1114_v7, %v1062_v10  ;;  %v1066_v14 = vadd.f32 %v1065_v12, %v742_v58  ;;  %v1120_v15 = vpop.f32.mrf.mxu0 }
 0x316   : > { %v1067_v16 = vpop.f32.mrf.mxu1 }
 0x317   : > { %1130 = vst [vmem:[%s1812_s9 + $0x18] sm:$0xff] %v1115_v13  ;;  %v1119_v18 = vadd.f32 %v1118_v11, %v1066_v14  ;;  %v1068_v19 = vadd.f32 %v1067_v16, %v746_v59  ;;  %v1122_v20 = vpop.f32.mrf.mxu0 }
 0x318   : > { %v1069_v21 = vpop.f32.mrf.mxu1 }
 0x319   : > { %1131 = vst [vmem:[%s1812_s9 + $0x20] sm:$0xff] %v1119_v18  ;;  %v1121_v22 = vadd.f32 %v1120_v15, %v1068_v19  ;;  %v1070_v23 = vadd.f32 %v1069_v21, %v742_v58  ;;  %v1124_v27 = vpop.f32.mrf.mxu0 }
 0x31a   : > { %v1071_v24 = vpop.f32.mrf.mxu1 }
 0x31b   : > { %1132 = vst [vmem:[%s1812_s9 + $0x28] sm:$0xff] %v1121_v22  ;;  %v1123_v25 = vadd.f32 %v1122_v20, %v1070_v23  ;;  %v1072_v26 = vadd.f32 %v1071_v24, %v746_v59 }
 0x31d   : > { %1133 = vst [vmem:[%s1812_s9 + $0x30] sm:$0xff] %v1123_v25  ;;  %v1125_v28 = vadd.f32 %v1124_v27, %v1072_v26 }
 0x31f   : > { %1134 = vst [vmem:[%s1812_s9 + $0x38] sm:$0xff] %v1125_v28 }
 0x320 PF: > { %s17_s21 = sadd.s32 1, %s1468_s21  }
 0x321   : > { %p14_p1 = scmp.ge.s32.totalorder %s17_s21, 4  }
 0x323   :  { %16 = sbr.rel (!%p14_p1) target bundleno = 1 (0x1), region = 79 }
 0x328   :  { %1156 = vsyncpa [#allocation5], 1 }
 0x329   :  { %1158 = vsyncpa [#allocation5 + $0x1], 1 }

</bundles_post_ra>
